<compile_context>
chip_gen: v6e
topology: v6e:2x2x1
jax: 0.10.0
libtpu: 0.0.40
codegen_flags: <defaults>
</compile_context>

<pallas_src>
import jax
import jax.numpy as jnp
from jax.experimental import pallas as pl
from jax.experimental.pallas import tpu as pltpu


def _round_up(x: int, m: int) -> int:
    return ((x + m - 1) // m) * m


def _vector_scaling_kernel(logits_ref, params_ref, out_ref):
    # params_ref: [2, C] in f32 — row 0 = W, row 1 = b (broadcast over batch rows).
    w = params_ref[0:1, :]
    b = params_ref[1:2, :]
    x = logits_ref[...].astype(jnp.float32)
    out_ref[...] = (x * w + b).astype(out_ref.dtype)


def vector_scaling_forward(
    logits: jax.Array,
    W: jax.Array,
    b: jax.Array,
    *,
    vmem_budget_bytes: int = 12 * 1024 * 1024,
) -> jax.Array:
    """Pallas equivalent of VectorScalingModel.forward.

    logits: [batch, num_classes]
    W, b:   [num_classes]
    """
    batch, num_classes = logits.shape
    dtype = logits.dtype
    itemsize = jnp.dtype(dtype).itemsize

    # ---- layout: lane-dense class axis, sublane-aligned batch axis -----------
    c_pad = _round_up(num_classes, 128)
    sublane = 8 * (4 // itemsize)          # 8 for f32, 16 for bf16, 32 for int8
    batch_pad = _round_up(batch, sublane)

    # ---- batch tile size: largest block that is VMEM-safe on v5e/v6e/v7x -----
    # Per grid step the pipeline holds 2 buffers of the logits tile + 2 of the
    # output tile (params are tiny and grid-invariant).
    bytes_per_row = 4 * c_pad * itemsize
    tb = max(sublane, (vmem_budget_bytes // bytes_per_row) // sublane * sublane)
    tb = min(tb, 1024, batch_pad)

    # ---- pad operands (no-ops when already aligned) ---------------------------
    x = logits
    if (batch_pad, c_pad) != (batch, num_classes):
        x = jnp.pad(x, ((0, batch_pad - batch), (0, c_pad - num_classes)))
    w32 = W.astype(jnp.float32)
    b32 = b.astype(jnp.float32)
    if c_pad != num_classes:
        w32 = jnp.pad(w32, (0, c_pad - num_classes), constant_values=1.0)
        b32 = jnp.pad(b32, (0, c_pad - num_classes))
    params = jnp.stack([w32, b32], axis=0)          # [2, c_pad], fetched once

    out = pl.pallas_call(
        _vector_scaling_kernel,
        out_shape=jax.ShapeDtypeStruct((batch_pad, c_pad), dtype),
        grid=(pl.cdiv(batch_pad, tb),),
        in_specs=[
            pl.BlockSpec((tb, c_pad), lambda i: (i, 0)),   # logits tile, batch-tiled
            pl.BlockSpec((2, c_pad), lambda i: (0, 0)),    # fused [W; b], grid-invariant
        ],
        out_specs=pl.BlockSpec((tb, c_pad), lambda i: (i, 0)),
        compiler_params=pltpu.CompilerParams(
            dimension_semantics=("parallel",),             # shard batch tiles across TCs (v7x)
        ),
    )(x, params)

    # TODO(synk): optional input_output_aliases on the padded logits buffer would
    # cut peak HBM footprint when the caller does not need logits afterwards.
    return out[:batch, :num_classes]


if __name__ == "__main__":
    batch = 2
    num_classes = 16

    key = jax.random.PRNGKey(0)
    k_logits, k_w, k_b = jax.random.split(key, 3)
    logits = jax.random.normal(k_logits, (batch, num_classes), dtype=jnp.float32)

    # 1) Deterministic parameter init matching the PyTorch module's __init__:
    #    W = ones(num_classes), b = zeros(num_classes)
    W0 = jnp.ones((num_classes,), dtype=jnp.float32)
    b0 = jnp.zeros((num_classes,), dtype=jnp.float32)
    out0 = jax.block_until_ready(vector_scaling_forward(logits, W0, b0))
    ref0 = logits * W0[None, :] + b0[None, :]
    assert out0.shape == (batch, num_classes)
    assert jnp.allclose(out0, ref0, atol=1e-6), "mismatch vs reference (init params)"

    # 2) Non-trivial (trained-like) parameters to exercise the scale + shift.
    W1 = jax.random.normal(k_w, (num_classes,), dtype=jnp.float32)
    b1 = jax.random.normal(k_b, (num_classes,), dtype=jnp.float32)
    out1 = jax.block_until_ready(vector_scaling_forward(logits, W1, b1))
    ref1 = logits * W1[None, :] + b1[None, :]
    assert jnp.allclose(out1, ref1, atol=1e-6), "mismatch vs reference (random params)"

    print("KERNEL_OK")
</pallas_src>

<mosaic_0001>
module attributes {stable_mosaic.version = 11 : i64} {
  func.func @_vector_scaling_kernel(%arg0: i32, %arg1: memref<8x128xf32, #tpu.memory_space<vmem>>, %arg2: memref<2x128xf32, #tpu.memory_space<vmem>>, %arg3: memref<8x128xf32, #tpu.memory_space<vmem>>) attributes {dimension_semantics = [#tpu.dimension_semantics<parallel>], iteration_bounds = array<i64: 1>, scalar_prefetch = 0 : i64, scratch_operands = 0 : i64, tpu.core_type = #tpu.core_type<tc>, window_params = [{transform_indices = @transform_0, window_bounds = array<i64: 8, 128>}, {pipeline_mode = #tpu.pipeline_mode<synchronous>, transform_indices = @transform_1, window_bounds = array<i64: 2, 128>}, {transform_indices = @transform_2, window_bounds = array<i64: 8, 128>}]} {
    %c0 = arith.constant 0 : index
    %c0_0 = arith.constant 0 : index
    %0 = vector.load %arg2[%c0, %c0_0] : memref<2x128xf32, #tpu.memory_space<vmem>>, vector<1x128xf32>
    %c1 = arith.constant 1 : index
    %c0_1 = arith.constant 0 : index
    %1 = vector.load %arg2[%c1, %c0_1] : memref<2x128xf32, #tpu.memory_space<vmem>>, vector<1x128xf32>
    %c0_2 = arith.constant 0 : index
    %c0_3 = arith.constant 0 : index
    %2 = vector.load %arg1[%c0_2, %c0_3] : memref<8x128xf32, #tpu.memory_space<vmem>>, vector<8x128xf32>
    %3 = vector.broadcast %0 : vector<1x128xf32> to vector<8x128xf32>
    %4 = arith.mulf %2, %3 : vector<8x128xf32>
    %5 = vector.broadcast %1 : vector<1x128xf32> to vector<8x128xf32>
    %6 = arith.addf %4, %5 : vector<8x128xf32>
    %c0_4 = arith.constant 0 : index
    %c0_5 = arith.constant 0 : index
    %7 = vector.load %arg3[%c0_4, %c0_5] : memref<8x128xf32, #tpu.memory_space<vmem>>, vector<8x128xf32>
    tpu.vector_store %arg3[%c0_4, %c0_5], %6 {strides = array<i32>} : memref<8x128xf32, #tpu.memory_space<vmem>>, vector<8x128xf32>,
    return
  }
  func.func @transform_0(%arg0: i32) -> (i32, i32) {
    %c0_i32 = arith.constant 0 : i32
    %c0_i32_0 = arith.constant 0 : i32
    return %arg0, %c0_i32 : i32, i32
  }
  func.func @transform_1(%arg0: i32) -> (i32, i32) {
    %c0_i32 = arith.constant 0 : i32
    %c0_i32_0 = arith.constant 0 : i32
    %c0_i32_1 = arith.constant 0 : i32
    return %c0_i32, %c0_i32_0 : i32, i32
  }
  func.func @transform_2(%arg0: i32) -> (i32, i32) {
    %c0_i32 = arith.constant 0 : i32
    %c0_i32_0 = arith.constant 0 : i32
    return %arg0, %c0_i32 : i32, i32
  }
}

</mosaic_0001>

<bundles_post_ra>
// kernel: tpu_custom_call.1
= control target key start
LH: loop header
LB: loop body
LE: loop exit
PB: predicated region body
PF: predicated region fallthrough
CT: control target
= control target key end

     0   :  { %7 = vsyncpa [#allocation3], 0  ;;  %s164_s0 = inlined_call_operand.hbm [shape: f32[8,128], index: 0, kind: input, shape index: {}]   ;;  %s165_s1 = inlined_call_operand.hbm [shape: f32[2,128], index: 1, kind: input, shape index: {}]   ;;  %s166_s2 = inlined_call_operand.hbm [shape: f32[8,128], index: 2, kind: output, shape index: {}]  }
   0x1   :  { %8 = vsyncpa [#allocation6], 0 }
   0x2   :  { %9 = vsyncpa [#allocation4], 0  ;;  %s137_s9 = smov [#allocation2]   ;;  %s138_s11 = smov [#allocation5]  }
   0x3   :  { %s16_s10 = sshll.u32 %s137_s9, 4  ;;  %s26_s12 = sshll.u32 %s138_s11, 4  ;;  %s17_s10 = int_to_ptr.vmem [resolvable:$true] %s16_s10  ;;  %s27_s12 = int_to_ptr.vmem [resolvable:$true] %s26_s12 }
   0x4   :  { %s79_s13 = scalar_lea.vmem %s17_s10, 128  ;;  %p84_p1 = scmp.lt.s32.totalorder %s17_s10, %s17_s10 }
   0x5   :  { %p80_p0 = scmp.ne.s32.totalorder %s17_s10, %s79_s13  ;;  %p85_p2 = scmp.lt.s32.totalorder %s79_s13, %s79_s13 }
   0x7   :  { %p86_p3 = por %p85_p2, %p84_p1 }
   0x9   :  { %p87_p4 = pnand %p86_p3, %p80_p0 }
   0xb   :  { %90 = shalt.err (!%p87_p4)
}
   0xc   :  { %19 = dma.hbm_to_vmem [thread:$0]  %s164_s0, 128, %s17_s10, [#allocation3]  }
   0xd   :  { %s99_s16 = scalar_lea.vmem %s27_s12, 32  ;;  %p104_p6 = scmp.lt.s32.totalorder %s27_s12, %s27_s12 }
   0xe   :  { %p100_p5 = scmp.ne.s32.totalorder %s27_s12, %s99_s16  ;;  %p105_p7 = scmp.lt.s32.totalorder %s99_s16, %s99_s16 }
  0x10   :  { %p106_p8 = por %p105_p7, %p104_p6 }
  0x12   :  { %p107_p9 = pnand %p106_p8, %p100_p5 }
  0x14   :  { %110 = shalt.err (!%p107_p9)
}
  0x15   :  { %29 = dma.hbm_to_vmem [thread:$0]  %s165_s1, 32, %s27_s12, [#allocation6]  }
  0x16   :  { %131 = dma.done.wait [#allocation3], 128  }
  0x17   :  { %132 = vsyncadd [#allocation3], 4294967168 }
  0x18   :  { %133 = dma.done.wait [#allocation6], 32  }
  0x19   :  { %134 = vsyncadd [#allocation6], 4294967264  ;;  %v66_v0 = vld [vmem:[#allocation5] ss:$0 sm:$0xff]  ;;  %v67_v1 = vld [vmem:[#allocation5 + $0x1] ss:$0 sm:$0xff] }
  0x1a   :  { %v38_v2 = vld [vmem:[#allocation2] sm:$0xff]  ;;  %s139_s19 = smov [#allocation7]  }
  0x1b   :  { %s56_s0 = sshll.u32 %s139_s19, 4  ;;  %v43_v3 = vmul.f32 %v66_v0, %v38_v2  ;;  %s57_s0 = int_to_ptr.vmem [resolvable:$true] %s56_s0 }
  0x1c   :  { %s111_s20 = scalar_lea.vmem %s57_s0, 128  ;;  %p116_p11 = scmp.lt.s32.totalorder %s57_s0, %s57_s0 }
  0x1d   :  { %v48_v4 = vadd.f32 %v67_v1, %v43_v3  ;;  %p112_p10 = scmp.ne.s32.totalorder %s57_s0, %s111_s20  ;;  %p117_p12 = scmp.lt.s32.totalorder %s111_s20, %s111_s20 }
  0x1f   :  { %49 = vst [vmem:[#allocation7] sm:$0xff] %v48_v4  ;;  %p118_p13 = por %p117_p12, %p116_p11 }
  0x21   :  { %p119_p0 = pnand %p118_p13, %p112_p10 }
  0x23   :  { %122 = shalt.err (!%p119_p0)
}
  0x24   :  { %59 = dma.vmem_to_hbm [thread:$0]  %s57_s0, 128, %s166_s2, [#allocation4]  }
  0x25   :  { %135 = dma.done.wait [#allocation4], 128  }
  0x26   :  { %136 = vsyncadd [#allocation4], 4294967168 }
  0x27   :  { %63 = vsyncpa [#allocation3], 1 }
  0x28   :  { %64 = vsyncpa [#allocation6], 1 }
  0x29   :  { %65 = vsyncpa [#allocation4], 1 }

</bundles_post_ra>
